<compile_context>
chip_gen: v6e
topology: v6e:2x2x1
jax: 0.10.0
libtpu: 0.0.40
codegen_flags: <defaults>
</compile_context>

<pallas_src>
import functools

import jax
import jax.numpy as jnp
from jax.experimental import pallas as pl
from jax.experimental.pallas import tpu as pltpu


def _detection_kernel(gxy_ref, anc_ref, x_ref, out_ref, *, stride):
    # gxy_ref : VMEM (2, G)       row 0 = grid_x * stride, row 1 = grid_y * stride
    # anc_ref : VMEM (TB, 2, 1)   per-slab anchors in pixels (w, h)
    # x_ref   : VMEM (TB, A, G)   raw feature slabs for TB (batch, anchor) pairs
    # out_ref : VMEM (TB, A, G)   decoded predictions
    fs = jnp.float32(stride)

    xb = x_ref[...]                      # (TB, A, G)
    gxy = gxy_ref[...][None, :, :]       # (1, 2, G), already scaled by stride

    # center x/y: sigmoid(txy)*stride + grid_xy*stride   -- paired rows, one op
    out_ref[:, 0:2, :] = jax.nn.sigmoid(xb[:, 0:2, :]) * fs + gxy

    # width/height: exp(twh) * anchor_wh (pixel anchors; stride already folded)
    out_ref[:, 2:4, :] = jnp.exp(xb[:, 2:4, :]) * anc_ref[...]

    # objectness
    out_ref[:, 4:5, :] = jax.nn.sigmoid(xb[:, 4:5, :])

    # class probabilities: softmax over the class (sublane) axis
    cls = xb[:, 5:, :]                                    # (TB, nC, G)
    m = jnp.max(cls, axis=1, keepdims=True)
    e = jnp.exp(cls - m)
    s = jnp.sum(e, axis=1, keepdims=True)
    # exact reciprocal keeps us inside the 1e-5 tolerance; approx=True would
    # be cheaper (EUP vrcp) but only ~2^-12 accurate.
    out_ref[:, 5:, :] = e * pl.reciprocal(s, approx=False)


def _slab_vmem_bytes(A, G):
    """f32 VMEM footprint of one (A, G) slab, rounded up to (8,128) tiles."""
    return 8 * pl.cdiv(A, 8) * 128 * pl.cdiv(G, 128) * 4


def _pick_chunking(n_slabs, slab_bytes, vmem_budget_bytes=8 << 20):
    """Pick slabs-per-block TB (divisor of n_slabs) under a VMEM budget.

    Budget accounts for double-buffered input + output (4 * TB * slab_bytes).
    Prefers >= 2 grid steps when n_slabs allows it (v7x megacore sharding).
    """
    max_tb = max(1, vmem_budget_bytes // (4 * slab_bytes))
    tb = 1
    for cand in range(min(n_slabs, max_tb), 0, -1):
        if n_slabs % cand == 0:
            tb = cand
            break
    if n_slabs // tb == 1 and n_slabs >= 2:
        for cand in range(n_slabs // 2, 0, -1):
            if n_slabs % cand == 0:
                tb = cand
                break
    return tb, n_slabs // tb


def detection_layer(x, anchors, num_classes, reso, *, transpose_output=True):
    """Eval-mode DetectionLayer.forward.

    Args:
      x: (bs, (5+num_classes)*nA, gs, gs) float32 feature map (NCHW).
    Returns:
      (bs, nA*gs*gs, 5+num_classes) float32 detections (or the kernel-native
      (bs*nA, 5+num_classes, gs*gs) layout if transpose_output=False).
    """
    bs, _, gs, _ = x.shape
    nA = len(anchors)
    A = 5 + num_classes
    G = gs * gs
    stride = reso // gs
    fs = jnp.float32(stride)

    # grid_x[j*gs + i] = i ; grid_y[j*gs + i] = j  (matches torch grid_x/grid_y),
    # pre-scaled by stride so the kernel does a single mul+add for bx/by.
    gi = jnp.arange(gs, dtype=jnp.float32)
    gx = jnp.tile(gi, (gs,))                  # (G,)
    gy = jnp.repeat(gi, gs)                   # (G,)
    gxy = jnp.stack([gx, gy], axis=0) * fs    # (2, G)

    # Per-slab anchors in pixels ( == (a/stride)*stride ), so the bw/bh
    # multiply vectorizes across all slabs in a block with no extra stride mul
    # and no scalar-indexed SMEM reads in the hot path.
    anchor_slab = jnp.tile(
        jnp.asarray(anchors, dtype=jnp.float32), (bs, 1)
    ).reshape(bs * nA, 2, 1)

    # (bs, nA*A, gs, gs) -> (bs*nA, A, G): pure contiguous reshape, no copy.
    x_r = x.reshape(bs * nA, A, G).astype(jnp.float32)

    n_slabs = bs * nA
    tb, n_chunks = _pick_chunking(n_slabs, _slab_vmem_bytes(A, G))

    kernel = functools.partial(_detection_kernel, stride=stride)

    out = pl.pallas_call(
        kernel,
        out_shape=jax.ShapeDtypeStruct((n_slabs, A, G), jnp.float32),
        grid=(n_chunks,),
        in_specs=[
            pl.BlockSpec((2, G), lambda c: (0, 0)),        # scaled grid x/y (shared)
            pl.BlockSpec((tb, 2, 1), lambda c: (c, 0, 0)),  # per-slab anchors
            pl.BlockSpec((tb, A, G), lambda c: (c, 0, 0)),  # feature slabs
        ],
        out_specs=pl.BlockSpec((tb, A, G), lambda c: (c, 0, 0)),
        compiler_params=pltpu.CompilerParams(
            dimension_semantics=("parallel",),
        ),
    )(gxy, anchor_slab, x_r)

    if not transpose_output:
        return out  # (bs*nA, A, G) kernel-native layout

    # (bs*nA, A, G) -> (bs, nA, gs, gs, A) -> (bs, nA*gs*gs, A)
    # NOTE: this transpose is one extra HBM pass done by XLA; it is kept
    # outside the kernel because an (..., A) minor in-kernel layout would force
    # masked partial stores (A << 128).
    out = out.reshape(bs, nA, A, gs, gs).transpose(0, 1, 3, 4, 2)
    return out.reshape(bs, -1, A)


def detection_layer_ref(x, anchors, num_classes, reso):
    """Pure-JAX reference of the eval-mode forward (for correctness check)."""
    bs, _, gs, _ = x.shape
    nA = len(anchors)
    A = 5 + num_classes
    stride = reso // gs
    scaled = jnp.array(
        [(a_w / stride, a_h / stride) for a_w, a_h in anchors], dtype=jnp.float32
    )
    xr = x.reshape(bs, nA, A, gs, gs).transpose(0, 1, 3, 4, 2)  # (bs,nA,gs,gs,A)
    tx = jax.nn.sigmoid(xr[..., 0])
    ty = jax.nn.sigmoid(xr[..., 1])
    tw = xr[..., 2]
    th = xr[..., 3]
    conf = jax.nn.sigmoid(xr[..., 4])
    cls = jax.nn.softmax(xr[..., 5:], axis=-1)
    grid_x = jnp.arange(gs, dtype=jnp.float32).reshape(1, 1, 1, gs)
    grid_y = jnp.arange(gs, dtype=jnp.float32).reshape(1, 1, gs, 1)
    aw = scaled[:, 0].reshape(1, nA, 1, 1)
    ah = scaled[:, 1].reshape(1, nA, 1, 1)
    px = (tx + grid_x) * stride
    py = (ty + grid_y) * stride
    pw = jnp.exp(tw) * aw * stride
    ph = jnp.exp(th) * ah * stride
    pred = jnp.concatenate(
        [px[..., None], py[..., None], pw[..., None], ph[..., None],
         conf[..., None], cls],
        axis=-1,
    )
    return pred.reshape(bs, -1, A)


def _check(bs, anchors, num_classes, reso, gs, key):
    nA = len(anchors)
    A = 5 + num_classes
    x = jax.random.normal(key, (bs, A * nA, gs, gs), dtype=jnp.float32)
    out = jax.block_until_ready(detection_layer(x, anchors, num_classes, reso))
    ref = detection_layer_ref(x, anchors, num_classes, reso)
    assert out.shape == (bs, nA * gs * gs, A), out.shape
    assert jnp.allclose(out, ref, rtol=1e-5, atol=1e-5), (
        float(jnp.max(jnp.abs(out - ref)))
    )


if __name__ == "__main__":
    anchors = [(10.0, 13.0), (16.0, 30.0), (33.0, 23.0)]   # nA = 3
    num_classes = 3                                        # num_attrs = 8
    key = jax.random.PRNGKey(0)
    k1, k2 = jax.random.split(key)

    # Lane-aligned grid (gs=16, G=256, stride=8).
    _check(bs=2, anchors=anchors, num_classes=num_classes, reso=128, gs=16, key=k1)
    # Non-128-aligned grid (gs=13, G=169, stride=32): exercises the
    # full-extent (unpadded) lane block path typical of YOLO heads.
    _check(bs=2, anchors=anchors, num_classes=num_classes, reso=416, gs=13, key=k2)

    print("KERNEL_OK")
</pallas_src>

<mosaic_0001>
module attributes {stable_mosaic.version = 11 : i64} {
  func.func @_detection_kernel(%arg0: i32, %arg1: memref<2x256xf32, #tpu.memory_space<vmem>>, %arg2: memref<3x2x1xf32, #tpu.memory_space<vmem>>, %arg3: memref<3x8x256xf32, #tpu.memory_space<vmem>>, %arg4: memref<3x8x256xf32, #tpu.memory_space<vmem>>) attributes {dimension_semantics = [#tpu.dimension_semantics<parallel>], iteration_bounds = array<i64: 2>, scalar_prefetch = 0 : i64, scratch_operands = 0 : i64, tpu.core_type = #tpu.core_type<tc>, window_params = [{pipeline_mode = #tpu.pipeline_mode<synchronous>, transform_indices = @transform_0, window_bounds = array<i64: 2, 256>}, {transform_indices = @transform_1, window_bounds = array<i64: 3, 2, 1>}, {transform_indices = @transform_2, window_bounds = array<i64: 3, 8, 256>}, {transform_indices = @transform_3, window_bounds = array<i64: 3, 8, 256>}]} {
    %c0 = arith.constant 0 : index
    %c0_0 = arith.constant 0 : index
    %c0_1 = arith.constant 0 : index
    %0 = vector.load %arg3[%c0, %c0_0, %c0_1] : memref<3x8x256xf32, #tpu.memory_space<vmem>>, vector<3x8x256xf32>
    %c0_2 = arith.constant 0 : index
    %c0_3 = arith.constant 0 : index
    %1 = vector.load %arg1[%c0_2, %c0_3] : memref<2x256xf32, #tpu.memory_space<vmem>>, vector<2x256xf32>
    %2 = vector.shape_cast %1 : vector<2x256xf32> to vector<1x2x256xf32>
    %3 = vector.extract_strided_slice %0 {offsets = [0, 0, 0], sizes = [3, 2, 256], strides = [1, 1, 1]} : vector<3x8x256xf32> to vector<3x2x256xf32>
    %4 = arith.negf %3 : vector<3x2x256xf32>
    %5 = math.exp %4 : vector<3x2x256xf32>
    %cst = arith.constant 1.000000e+00 : f32
    %6 = vector.broadcast %cst : f32 to vector<3x2x256xf32>
    %7 = arith.addf %6, %5 : vector<3x2x256xf32>
    %8 = arith.divf %6, %7 : vector<3x2x256xf32>
    %cst_4 = arith.constant 8.000000e+00 : f32
    %9 = vector.broadcast %cst_4 : f32 to vector<3x2x256xf32>
    %10 = arith.mulf %8, %9 : vector<3x2x256xf32>
    %11 = vector.broadcast %2 : vector<1x2x256xf32> to vector<3x2x256xf32>
    %12 = arith.addf %10, %11 : vector<3x2x256xf32>
    %c0_5 = arith.constant 0 : index
    %c0_6 = arith.constant 0 : index
    %c0_7 = arith.constant 0 : index
    %13 = vector.load %arg4[%c0_5, %c0_6, %c0_7] : memref<3x8x256xf32, #tpu.memory_space<vmem>>, vector<3x2x256xf32>
    tpu.vector_store %arg4[%c0_5, %c0_6, %c0_7], %12 {strides = array<i32>} : memref<3x8x256xf32, #tpu.memory_space<vmem>>, vector<3x2x256xf32>,
    %14 = vector.extract_strided_slice %0 {offsets = [0, 2, 0], sizes = [3, 2, 256], strides = [1, 1, 1]} : vector<3x8x256xf32> to vector<3x2x256xf32>
    %15 = math.exp %14 : vector<3x2x256xf32>
    %c0_8 = arith.constant 0 : index
    %c0_9 = arith.constant 0 : index
    %c0_10 = arith.constant 0 : index
    %16 = vector.load %arg2[%c0_8, %c0_9, %c0_10] : memref<3x2x1xf32, #tpu.memory_space<vmem>>, vector<3x2x1xf32>
    %17 = vector.broadcast %16 : vector<3x2x1xf32> to vector<3x2x256xf32>
    %18 = arith.mulf %15, %17 : vector<3x2x256xf32>
    %c0_11 = arith.constant 0 : index
    %c2 = arith.constant 2 : index
    %c0_12 = arith.constant 0 : index
    %19 = vector.load %arg4[%c0_11, %c2, %c0_12] : memref<3x8x256xf32, #tpu.memory_space<vmem>>, vector<3x2x256xf32>
    tpu.vector_store %arg4[%c0_11, %c2, %c0_12], %18 {strides = array<i32>} : memref<3x8x256xf32, #tpu.memory_space<vmem>>, vector<3x2x256xf32>,
    %20 = vector.extract_strided_slice %0 {offsets = [0, 4, 0], sizes = [3, 1, 256], strides = [1, 1, 1]} : vector<3x8x256xf32> to vector<3x1x256xf32>
    %21 = arith.negf %20 : vector<3x1x256xf32>
    %22 = math.exp %21 : vector<3x1x256xf32>
    %cst_13 = arith.constant 1.000000e+00 : f32
    %23 = vector.broadcast %cst_13 : f32 to vector<3x1x256xf32>
    %24 = arith.addf %23, %22 : vector<3x1x256xf32>
    %25 = arith.divf %23, %24 : vector<3x1x256xf32>
    %c0_14 = arith.constant 0 : index
    %c4 = arith.constant 4 : index
    %c0_15 = arith.constant 0 : index
    %26 = vector.load %arg4[%c0_14, %c4, %c0_15] : memref<3x8x256xf32, #tpu.memory_space<vmem>>, vector<3x1x256xf32>
    tpu.vector_store %arg4[%c0_14, %c4, %c0_15], %25 {strides = array<i32>} : memref<3x8x256xf32, #tpu.memory_space<vmem>>, vector<3x1x256xf32>,
    %27 = vector.extract_strided_slice %0 {offsets = [0, 5, 0], sizes = [3, 3, 256], strides = [1, 1, 1]} : vector<3x8x256xf32> to vector<3x3x256xf32>
    %cst_16 = arith.constant dense<0xFF800000> : vector<3x256xf32>
    %28 = vector.multi_reduction <maximumf>, %27, %cst_16 [1] : vector<3x3x256xf32> to vector<3x256xf32>
    %29 = vector.shape_cast %28 : vector<3x256xf32> to vector<3x1x256xf32>
    %30 = vector.broadcast %29 : vector<3x1x256xf32> to vector<3x3x256xf32>
    %31 = arith.subf %27, %30 : vector<3x3x256xf32>
    %32 = math.exp %31 : vector<3x3x256xf32>
    %cst_17 = arith.constant dense<0.000000e+00> : vector<3x256xf32>
    %33 = vector.multi_reduction <add>, %32, %cst_17 [1] : vector<3x3x256xf32> to vector<3x256xf32>
    %34 = vector.shape_cast %33 : vector<3x256xf32> to vector<3x1x256xf32>
    %35 = tpu.reciprocal %34 : vector<3x1x256xf32> -> vector<3x1x256xf32>
    %36 = vector.broadcast %35 : vector<3x1x256xf32> to vector<3x3x256xf32>
    %37 = arith.mulf %32, %36 : vector<3x3x256xf32>
    %c0_18 = arith.constant 0 : index
    %c5 = arith.constant 5 : index
    %c0_19 = arith.constant 0 : index
    %38 = vector.load %arg4[%c0_18, %c5, %c0_19] : memref<3x8x256xf32, #tpu.memory_space<vmem>>, vector<3x3x256xf32>
    tpu.vector_store %arg4[%c0_18, %c5, %c0_19], %37 {strides = array<i32>} : memref<3x8x256xf32, #tpu.memory_space<vmem>>, vector<3x3x256xf32>,
    return
  }
  func.func @transform_0(%arg0: i32) -> (i32, i32) {
    %c0_i32 = arith.constant 0 : i32
    %c0_i32_0 = arith.constant 0 : i32
    %c0_i32_1 = arith.constant 0 : i32
    return %c0_i32, %c0_i32_0 : i32, i32
  }
  func.func @transform_1(%arg0: i32) -> (i32, i32, i32) {
    %c0_i32 = arith.constant 0 : i32
    %c0_i32_0 = arith.constant 0 : i32
    %c0_i32_1 = arith.constant 0 : i32
    return %arg0, %c0_i32, %c0_i32_0 : i32, i32, i32
  }
  func.func @transform_2(%arg0: i32) -> (i32, i32, i32) {
    %c0_i32 = arith.constant 0 : i32
    %c0_i32_0 = arith.constant 0 : i32
    %c0_i32_1 = arith.constant 0 : i32
    return %arg0, %c0_i32, %c0_i32_0 : i32, i32, i32
  }
  func.func @transform_3(%arg0: i32) -> (i32, i32, i32) {
    %c0_i32 = arith.constant 0 : i32
    %c0_i32_0 = arith.constant 0 : i32
    %c0_i32_1 = arith.constant 0 : i32
    return %arg0, %c0_i32, %c0_i32_0 : i32, i32, i32
  }
}

</mosaic_0001>

<bundles_post_ra>
// kernel: tpu_custom_call.1
= control target key start
LH: loop header
LB: loop body
LE: loop exit
PB: predicated region body
PF: predicated region fallthrough
CT: control target
= control target key end

     0   :  { %8 = vsyncpa [#allocation3], 0  ;;  %s1184_s0 = inlined_call_operand.vmem [shape: f32[2,256], index: 0, kind: input, shape index: {}]   ;;  %s1185_s1 = inlined_call_operand.vmem [shape: f32[6,2,1], index: 1, kind: input, shape index: {}]   ;;  %s1186_s2 = inlined_call_operand.hbm [shape: f32[6,8,256], index: 2, kind: input, shape index: {}]   ;;  %s1187_s3 = inlined_call_operand.hbm [shape: f32[6,8,256], index: 3, kind: output, shape index: {}]  }
   0x1   :  { %10 = vsyncpa [#allocation3 + $0x1], 0 }
   0x2   :  { %11 = vsyncpa [#allocation4], 0 }
   0x3   :  { %13 = vsyncpa [#allocation4 + $0x1], 0  ;;  %s903_s12 = smov 0   ;;  %s905_s13 = smov 0  }
   0x4   :  { %s907_s14 = smov 0   ;;  %s909_s15 = smov 0  }
   0x5 LB: > { %s924_s16 = sadd.s32 4294967295, %s873_s15   ;;  %s638_s17 = sadd.s32 4294967294, %s873_s15   ;;  %s873_s15 = sphi %s909_s15, %s1203_s15   ;;  %s869_s14 = sphi %s907_s14, %s1202_s14   ;;  %s865_s13 = sphi %s905_s13, %s1201_s13   ;;  %s861_s12 = sphi %s903_s12, %s1200_s12  }
   0x6   : > { %s928_s18 = sadd.s32 1, %s873_s15   ;;  %s73_s19 = sadd.s32 1, %s869_s14 }
   0x7   : > { %s70_s20 = ssub.s32 %s873_s15, %s928_s18  ;;  %p80_p0 = scmp.ne.s32.totalorder %s869_s14, %s865_s13 }
   0x8   : > { %p71_p1 = scmp.eq.s32.totalorder %s70_s20, 0  ;;  %p81_p2 = scmp.eq.s32.totalorder %s873_s15, 0 }
   0x9   : > { %p86_p3 = scmp.ne.s32.totalorder %s865_s13, %s861_s12  ;;  %p87_p4 = scmp.eq.s32.totalorder %s924_s16, 0 }
   0xa   : > { %s940_s21 = scalar_select %p71_p1, %s869_s14, %s73_s19  }
   0xb   : > { %p82_p5 = por %p81_p2, %p80_p0  ;;  %p942_p6 = por %p87_p4, %p86_p3 }
   0xc   : > { %p110_p7 = scmp.eq.s32.totalorder %s924_s16, 1  ;;  %p116_p8 = scmp.eq.s32.totalorder %s638_s17, 1 }
   0xd   : > { %s1190_s22 = scalar_select %p942_p6, 1, 0 }
   0xe   : > { %p679_p10 = scmp.lt.s32.totalorder %s873_s15, 2  ;;  %p949_p11 = por %p110_p7, %p80_p0 }
   0xf   : > { %p953_p12 = por %p116_p8, %p86_p3  ;;  %s148_s25 = sand.u32 1, %s869_s14  }
  0x10   : > { %s1191_s23 = scalar_select %p949_p11, 1, 0 }
  0x11   : > { %s1192_s24 = scalar_select %p953_p12, 1, 0 }
  0x12   : > { %s663_s26 = smul.u32 768, %s873_s15  ;;  %p964_p13 = pnand %p679_p10, %p82_p5 }
  0x13   : > { %s665_s27 = smul.u32 48, %s148_s25  ;;  %s970_s7 = scalar_lea.sflag [#allocation3], %s148_s25 }
  0x14   : > { %s962_s30 = scalar_lea.hbm %s1186_s2, %s663_s26  ;;  %p783_p1 = pneg %p964_p13 }
  0x15   : > { %s152_s5 = scalar_lea.vmem [#allocation2], %s665_s27  ;;  %s781_s8 = scalar_lea.hbm %s962_s30, 768 }
  0x16   : > { %s160_s6 = sshll.u32 %s152_s5, 4  ;;  %p782_p0 = scmp.ne.s32.totalorder %s962_s30, %s781_s8  ;;  %s968_s6 = int_to_ptr.vmem [resolvable:$true] %s160_s6 }
  0x17   : > { %s786_s11 = scalar_lea.hbm %s1186_s2, 1536  ;;  %p787_p4 = scmp.lt.s32.totalorder %s962_s30, %s1186_s2 }
  0x18   : > { %p784_p2 = pnand %p783_p1, %p782_p0  ;;  %p788_p5 = scmp.lt.s32.totalorder %s786_s11, %s781_s8 }
  0x1a   : > { %p785_p3 = pneg %p784_p2  ;;  %p789_p7 = por %p788_p5, %p787_p4 }
  0x1c   : > { %p790_p8 = pnand %p789_p7, %p785_p3 }
  0x1e   : > { %793 = shalt.err (!%p790_p8)
}
  0x1f   : > { %s794_s20 = scalar_lea.vmem %s968_s6, 768  ;;  %s875_s25 = smov [#allocation2]  }
  0x20   : > { %p795_p10 = scmp.ne.s32.totalorder %s968_s6, %s794_s20  ;;  %s799_s26 = sshll.u32 %s875_s25, 4  ;;  %s800_s26 = int_to_ptr.vmem [resolvable:$false] %s799_s26 }
  0x21   : > { %s801_s27 = scalar_lea.vmem %s800_s26, 1536  ;;  %p802_p2 = scmp.lt.s32.totalorder %s968_s6, %s800_s26 }
  0x22   : > { %p797_p9 = pnand %p795_p10, %p783_p1  ;;  %p803_p12 = scmp.lt.s32.totalorder %s801_s27, %s794_s20 }
  0x24   : > { %p798_p0 = pneg %p797_p9  ;;  %p804_p11 = por %p803_p12, %p802_p2 }
  0x26   : > { %p805_p6 = pnand %p804_p11, %p798_p0 }
  0x28   : > { %808 = shalt.err (!%p805_p6)
}
  0x29   : > { %s876_s28 = smov 256   ;;  %s877_s29 = smov 16  }
  0x2a   : > { %674 = dma.hbm_to_vmem [thread:$0]  (!%p964_p13), %s962_s30, 768, %s968_s6, %s970_s7, %s876_s28, %s876_s28, %s877_s29  }
  0x2b   : > { %p643_p9 = scmp.ge.s32.totalorder %s873_s15, 1  ;;  %p168_p1 = scmp.lt.s32.totalorder %s873_s15, 3 }
  0x2d   : > { %p169_p3 = pnand %p643_p9, %p168_p1 }
  0x2e   : > { %s994_s5 = sand.u32 (!%p169_p3), 1, %s865_s13   ;;  %p1194_p6 = scmp.ne.s32.totalorder (!%p169_p3), %s1190_s22, 0 }
  0x2f   : > { %172 = sbr.rel (%p169_p3) target bundleno = 207 (0xcf), region = 32  ;;  %s175_s9 = scalar_lea.sflag (!%p169_p3), [#allocation3], %s994_s5 }
  0x30   : > { %s666_s8 = smul.u32 (!%p169_p3), 48, %s994_s5 }
  0x32   : > { %s1000_s10 = scalar_lea.vmem (!%p169_p3), [#allocation2], %s666_s8 }
  0x34   : > { %852 = dma.done.wait (%p1194_p6), %s175_s9, 768  }
  0x35   : > { %854 = vsyncadd (%p1194_p6), %s175_s9, 4294966528  ;;  %s206_s30 = smul.u32 3, %s924_s16  ;;  %v878_v0 = vmov 0   ;;  %vm398_vm0 = vcmask 1047557   ;;  %v1011_v1 = vld [vmem:[%s1000_s10] sm:$0xff]  ;;  %v1014_v2 = vld [vmem:[%s1000_s10 + $0x8] sm:$0xff] }
  0x36   : > { %719 = vset.pattern.permute.xlu0 %v878_v0  ;;  %720 = vset.pattern.permute.xlu1 %v878_v0  ;;  %v645_v5 = vmul.f32 -1.442695, %v1011_v1  ;;  %v646_v6 = vmul.f32 -1.442695, %v1014_v2  ;;  %v399_v8 = vsel %vm398_vm0, %v1011_v1, -inf  ;;  %v406_v9 = vsel %vm398_vm0, %v1014_v2, -inf }
  0x37   : > { %p207_p11 = scmp.lt.s32.totalorder %s206_s30, 5  ;;  %v1023_v10 = vld [vmem:[%s1000_s10 + $0x20] sm:$0xff]  ;;  %v400_v11 = vrot.slane %v399_v8, 4  ;;  %v407_v12 = vrot.slane %v406_v9, 4  ;;  %v1026_v13 = vld [vmem:[%s1000_s10 + $0x28] sm:$0xff]  ;;  %v1033_v19 = vld [vmem:[%s1000_s10 + $0x10] sm:$0xff] }
  0x38   : > { %721 = vpow2.f32 %v645_v5  ;;  %v649_v14 = vmul.f32 -1.442695, %v1023_v10  ;;  %v650_v15 = vmul.f32 -1.442695, %v1026_v13  ;;  %v427_v18 = vsel %vm398_vm0, %v1023_v10, -inf  ;;  %v1039_v26 = vld [vmem:[%s1000_s10 + $0x18] sm:$0xff] }
  0x39   : > { %s1205_s30 = smov (!%p207_p11, %s206_s30), 5  ;;  %723 = vpow2.f32 %v646_v6  ;;  %v401_v16 = vmax.f32 %v399_v8, %v400_v11  ;;  %v408_v17 = vmax.f32 %v406_v9, %v407_v12  ;;  %v428_v20 = vrot.slane %v427_v18, 4  ;;  %s1070_s19 = scalar_lea.vmem [#allocation5], %s666_s8 }
  0x3a   : > { %s644_s4 = sshll.u32 %s1205_s30, 1  ;;  %v434_v21 = vsel %vm398_vm0, %v1026_v13, -inf  ;;  %v647_v22 = vmul.f32 -1.442695, %v1033_v19  ;;  %725 = vpow2.f32 %v649_v14  ;;  %v648_v28 = vmul.f32 -1.442695, %v1039_v26 }
  0x3b   : > { %s210_s11 = scalar_lea.vmem %s1185_s1, %s644_s4  ;;  %v402_v23 = vrot.slane %v401_v16, 2  ;;  %v409_v24 = vrot.slane %v408_v17, 2  ;;  %v435_v25 = vrot.slane %v434_v21, 4  ;;  %727 = vpow2.f32 %v650_v15  ;;  %s664_s20 = smul.u32 768, %s924_s16 }
  0x3c   : > { %v298_v3 = vld [vmem:[%s210_s11] sm:$0x3]  ;;  %v300_v4 = vld [vmem:[%s210_s11 + $0x4] sm:$0x3]  ;;  %v299_v7 = vld [vmem:[%s210_s11 + $0x2] sm:$0x3]  ;;  %v429_v27 = vmax.f32 %v427_v18, %v428_v20  ;;  %729 = vpow2.f32 %v647_v22  ;;  %v341_v12 = vlaneseq }
  0x3d   : > { %303 = vperm.xlu0 %719, %v298_v3   ;;  %311 = vperm.xlu1 %720, %v300_v4   ;;  %v403_v29 = vmax.f32 %v401_v16, %v402_v23  ;;  %v410_v30 = vmax.f32 %v408_v17, %v409_v24  ;;  %v436_v31 = vmax.f32 %v434_v21, %v435_v25  ;;  %v413_v33 = vsel %vm398_vm0, %v1033_v19, -inf  ;;  %s553_s25 = sshll.u32 %s1070_s19, 4  ;;  %s1137_s16 = scalar_lea.hbm %s1187_s3, %s664_s20  ;;  %s1139_s25 = int_to_ptr.vmem [resolvable:$true] %s553_s25 }
  0x3e   : > { %v430_v32 = vrot.slane %v429_v27, 2  ;;  %731 = vpow2.f32 %v648_v28  ;;  %v414_v38 = vrot.slane %v413_v33, 4  ;;  %v420_v39 = vsel %vm398_vm0, %v1039_v26, -inf  ;;  %s539_s28 = scalar_lea.sflag [#allocation4], %s994_s5  ;;  %s809_s29 = scalar_lea.vmem %s1139_s25, 768 }
  0x3f   : > { %v404_v34 = vrot.slane %v403_v29, 1  ;;  %v411_v35 = vrot.slane %v410_v30, 1  ;;  %v437_v36 = vrot.slane %v436_v31, 2  ;;  %v421_v45 = vrot.slane %v420_v39, 4  ;;  %p810_p12 = scmp.ne.s32.totalorder %s1139_s25, %s809_s29  ;;  %p1197_p13 = scmp.ne.s32.totalorder %s1191_s23, 0 }
  0x40   : > { %v431_v37 = vmax.f32 %v429_v27, %v430_v32  ;;  %v415_v44 = vmax.f32 %v413_v33, %v414_v38  ;;  %v879_v15 = vmov 1966171168   ;;  %v342_v27 = vshrl.u32 %v341_v12, 7  ;;  %s880_s8 = smov [#allocation5]  }
  0x41   : > { %307 = vperm.xlu0 %719, %v299_v7   ;;  %v405_v40 = vmax.f32 %v403_v29, %v404_v34  ;;  %v412_v41 = vmax.f32 %v410_v30, %v411_v35  ;;  %v438_v42 = vmax.f32 %v436_v31, %v437_v36  ;;  %v422_v52 = vmax.f32 %v420_v39, %v421_v45  ;;  %v651_v29 = vld.sshfl [vmem:[%s1184_s0] sm:$0x33 pattern:$0x76325410]  ;;  %p811_p4 = pnand %p810_p12, %p1197_p13  ;;  %s813_s9 = sshll.u32 %s880_s8, 4  ;;  %s814_s9 = int_to_ptr.vmem [resolvable:$false] %s813_s9 }
  0x42   : > { %v432_v43 = vrot.slane %v431_v37, 1  ;;  %v416_v51 = vrot.slane %v415_v44, 2  ;;  %v339_v16 = vunpack.c.l.s4 %v879_v15  ;;  %v271_v32 = vcombine.high %v651_v29, %v651_v29  ;;  %s815_s10 = scalar_lea.vmem %s814_s9, 1536  ;;  %p816_p7 = scmp.lt.s32.totalorder %s1139_s25, %s814_s9 }
  0x43   : > { %v441_v46 = vsub.f32 %v1011_v1, %v405_v40  ;;  %v442_v47 = vsub.f32 %v1014_v2, %v412_v41  ;;  %v439_v48 = vrot.slane %v438_v42, 1  ;;  %v423_v61 = vrot.slane %v422_v52, 2  ;;  %p812_p5 = pneg %p811_p4  ;;  %p817_p8 = scmp.lt.s32.totalorder %s815_s10, %s809_s29 }
  0x44   : > { %v433_v50 = vmax.f32 %v431_v37, %v432_v43  ;;  %v417_v60 = vmax.f32 %v415_v44, %v416_v51  ;;  %v340_v25 = vunpack.c.0.s8 %v339_v16  ;;  %vm477_vm1 = vcmask 1042432  }
  0x45   : > { %v722_v49 = vpop.eup %721  ;;  %v447_v55 = vmul.f32 1.442695, %v441_v46  ;;  %v449_v56 = vmul.f32 1.442695, %v442_v47  ;;  %v440_v57 = vmax.f32 %v438_v42, %v439_v48  ;;  %v424_v3 = vmax.f32 %v422_v52, %v423_v61  ;;  %p818_p10 = por %p817_p8, %p816_p7 }
  0x46   : > { %v724_v53 = vpop.eup %723  ;;  %v239_v54 = vadd.f32 1.0, %v722_v49  ;;  %v445_v59 = vsub.f32 %v1023_v10, %v433_v50  ;;  %v418_v0 = vrot.slane %v417_v60, 1  ;;  %v1055_v31 = vsub.s32 %v340_v25, %v342_v27 }
  0x47   : > { %v240_v58 = vadd.f32 1.0, %v724_v53  ;;  %v446_v62 = vsub.f32 %v1026_v13, %v440_v57  ;;  %v726_v63 = vpop.eup %725  ;;  %v425_v11 = vrot.slane %v424_v3, 1  ;;  %vm1064_vm2 = vcmp.lt.s32.totalorder %v341_v12, 256  ;;  %p819_p0 = pnand %p818_p10, %p812_p5 }
  0x48   : > { %733 = vrcp.f32 %v239_v54  ;;  %v728_v4 = vpop.eup %727  ;;  %v243_v5 = vadd.f32 1.0, %v726_v63  ;;  %v455_v6 = vmul.f32 1.442695, %v445_v59  ;;  %v419_v9 = vmax.f32 %v417_v60, %v418_v0 }
  0x49   : > { %735 = vrcp.f32 %v240_v58  ;;  %v457_v7 = vmul.f32 1.442695, %v446_v62  ;;  %v244_v8 = vadd.f32 1.0, %v728_v4  ;;  %v730_v14 = vpop.eup %729  ;;  %v426_v17 = vmax.f32 %v424_v3, %v425_v11 }
  0x4a   : > { %737 = vpow2.f32 %v447_v55  ;;  %v443_v18 = vsub.f32 %v1033_v19, %v419_v9  ;;  %v241_v21 = vadd.f32 1.0, %v730_v14 }
  0x4b   : > { %739 = vpow2.f32 %v449_v56  ;;  %v732_v20 = vpop.eup %731  ;;  %v444_v23 = vsub.f32 %v1039_v26, %v426_v17 }
  0x4c   : > { %741 = vrcp.f32 %v243_v5  ;;  %v242_v22 = vadd.f32 1.0, %v732_v20  ;;  %v451_v24 = vmul.f32 1.442695, %v443_v18 }
  0x4d   : > { %743 = vrcp.f32 %v244_v8  ;;  %v453_v28 = vmul.f32 1.442695, %v444_v23 }
  0x4e   : > { %745 = vpow2.f32 %v455_v6 }
  0x4f   : > { %747 = vpow2.f32 %v457_v7 }
  0x50   : > { %749 = vrcp.f32 %v241_v21 }
  0x51   : > { %751 = vrcp.f32 %v242_v22 }
  0x52   : > { %753 = vpow2.f32 %v451_v24 }
  0x53   : > { %755 = vpow2.f32 %v453_v28 }
  0x55   : > { %v734_v30 = vpop.eup %733 }
  0x56   : > { %v736_v33 = vpop.eup %735  ;;  %v257_v34 = vmul.f32 8.0, %v734_v30 }
  0x57   : > { %v1057_v35 = vpop.eup %737  ;;  %v258_v36 = vmul.f32 8.0, %v736_v33  ;;  %v337_v37 = vcombine.high %v734_v30, %v736_v33 }
  0x58   : > { %v1059_v38 = vpop.eup %739  ;;  %v274_v39 = vadd.f32 %v651_v29, %v257_v34  ;;  %v465_v40 = vrot.slane %v1057_v35, 5 }
  0x59   : > { %v742_v41 = vpop.eup %741  ;;  %v275_v42 = vadd.f32 %v271_v32, %v258_v36  ;;  %v344_v43 = vrot.slane %v337_v37, %v1055_v31  ;;  %v466_v44 = vrot.slane %v1059_v38, 5 }
  0x5a   : > { %v744_v45 = vpop.eup %743  ;;  %280 = vst [vmem:[%s1070_s19] sm:$0x3] %v274_v39  ;;  %v478_v47 = vsel %vm477_vm1, %v465_v40, 0.0  ;;  %v261_v48 = vmul.f32 8.0, %v742_v41 }
  0x5b   : > { %v1074_v49 = vpop.eup %745  ;;  %281 = vst [vmem:[%s1070_s19 + $0x8] sm:$0x3] %v275_v42  ;;  %v351_v50 = vrot.slane %v344_v43, %v1055_v31  ;;  %v479_v51 = vrot.slane %v478_v47, 4  ;;  %v485_v52 = vsel %vm477_vm1, %v466_v44, 0.0  ;;  %v262_v53 = vmul.f32 8.0, %v744_v45 }
  0x5c   : > { %v1079_v54 = vpop.eup %747  ;;  %v486_v55 = vrot.slane %v485_v52, 4  ;;  %v278_v56 = vadd.f32 %v651_v29, %v261_v48  ;;  %v367_v57 = vcombine.high %v742_v41, %v744_v45  ;;  %v469_v58 = vrot.slane %v1074_v49, 5 }
  0x5d   : > { %v750_v59 = vpop.eup %749  ;;  %652 = vst.msk [vmem:[%s1070_s19 + $0x4] ss:$8 sm:$0x3] %vm1064_vm2, %v351_v50  ;;  %v480_v60 = vadd.f32 %v479_v51, %v478_v47  ;;  %v279_v61 = vadd.f32 %v271_v32, %v262_v53  ;;  %v470_v62 = vrot.slane %v1079_v54, 5 }
  0x5e   : > { %v752_v63 = vpop.eup %751  ;;  %v487_v0 = vadd.f32 %v486_v55, %v485_v52  ;;  %284 = vst [vmem:[%s1070_s19 + $0x20] sm:$0x3] %v278_v56  ;;  %v374_v3 = vrot.slane %v367_v57, %v1055_v31  ;;  %v506_v4 = vsel %vm477_vm1, %v469_v58, 0.0  ;;  %v259_v5 = vmul.f32 8.0, %v750_v59 }
  0x5f   : > { %v1089_v6 = vpop.eup %753  ;;  %v481_v7 = vrot.slane %v480_v60, 2  ;;  %285 = vst [vmem:[%s1070_s19 + $0x28] sm:$0x3] %v279_v61  ;;  %v507_v8 = vrot.slane %v506_v4, 4  ;;  %v513_v9 = vsel %vm477_vm1, %v470_v62, 0.0  ;;  %v260_v11 = vmul.f32 8.0, %v752_v63 }
  0x60   : > { %v1093_v12 = vpop.eup %755  ;;  %v488_v14 = vrot.slane %v487_v0, 2  ;;  %v381_v15 = vrot.slane %v374_v3, %v1055_v31  ;;  %v514_v16 = vrot.slane %v513_v9, 4  ;;  %v276_v17 = vadd.f32 %v651_v29, %v259_v5 }
  0x61   : > { %v482_v18 = vadd.f32 %v481_v7, %v480_v60  ;;  %v508_v20 = vadd.f32 %v507_v8, %v506_v4  ;;  %v277_v21 = vadd.f32 %v271_v32, %v260_v11  ;;  %v352_v22 = vcombine.high %v750_v59, %v752_v63 }
  0x62   : > { %v489_v23 = vadd.f32 %v488_v14, %v487_v0  ;;  %654 = vst.msk [vmem:[%s1070_s19 + $0x24] ss:$8 sm:$0x3] %vm1064_vm2, %v381_v15  ;;  %v515_v24 = vadd.f32 %v514_v16, %v513_v9  ;;  %282 = vst [vmem:[%s1070_s19 + $0x10] sm:$0x3] %v276_v17  ;;  %v467_v25 = vrot.slane %v1089_v6, 5 }
  0x63   : > { %v468_v27 = vrot.slane %v1093_v12, 5  ;;  %v483_v28 = vrot.slane %v482_v18, 1  ;;  %v509_v30 = vrot.slane %v508_v20, 2  ;;  %283 = vst [vmem:[%s1070_s19 + $0x18] sm:$0x3] %v277_v21  ;;  %v359_v29 = vrot.slane %v352_v22, %v1055_v31 }
  0x64   : > { %v490_v33 = vrot.slane %v489_v23, 1  ;;  %v516_v34 = vrot.slane %v515_v24, 2  ;;  %v492_v32 = vsel %vm477_vm1, %v467_v25, 0.0  ;;  %v294_v14 = vmul.f32 1.442695, %v1023_v10 }
  0x65   : > { %v499_v36 = vsel %vm477_vm1, %v468_v27, 0.0  ;;  %v484_v37 = vadd.f32 %v483_v28, %v482_v18  ;;  %v510_v39 = vadd.f32 %v509_v30, %v508_v20  ;;  %v366_v40 = vrot.slane %v359_v29, %v1055_v31 }
  0x66   : > { %v493_v41 = vrot.slane %v492_v32, 4  ;;  %v491_v42 = vadd.f32 %v490_v33, %v489_v23  ;;  %v517_v43 = vadd.f32 %v516_v34, %v515_v24  ;;  %v500_v44 = vrot.slane %v499_v36, 4 }
  0x67   : > { %757 = vrcp.f32 %v484_v37  ;;  %v511_v45 = vrot.slane %v510_v39, 1  ;;  %653 = vst.msk [vmem:[%s1070_s19 + $0x14] ss:$8 sm:$0x3] %vm1064_vm2, %v366_v40 }
  0x68   : > { %v494_v47 = vadd.f32 %v493_v41, %v492_v32  ;;  %759 = vrcp.f32 %v491_v42  ;;  %v518_v48 = vrot.slane %v517_v43, 1  ;;  %v501_v50 = vadd.f32 %v500_v44, %v499_v36 }
  0x69   : > { %v512_v51 = vadd.f32 %v511_v45, %v510_v39 }
  0x6a   : > { %v495_v52 = vrot.slane %v494_v47, 2  ;;  %v519_v53 = vadd.f32 %v518_v48, %v517_v43  ;;  %v502_v55 = vrot.slane %v501_v50, 2 }
  0x6b   : > { %761 = vrcp.f32 %v512_v51 }
  0x6c   : > { %v496_v31 = vadd.f32 %v495_v52, %v494_v47  ;;  %763 = vrcp.f32 %v519_v53  ;;  %v503_v56 = vadd.f32 %v502_v55, %v501_v50 }
  0x6e   : > { %v497_v57 = vrot.slane %v496_v31, 1  ;;  %v504_v58 = vrot.slane %v503_v56, 1 }
  0x70   : > { %v498_v46 = vadd.f32 %v497_v57, %v496_v31  ;;  %v505_v59 = vadd.f32 %v504_v58, %v503_v56 }
  0x72   : > { %765 = vrcp.f32 %v498_v46 }
  0x73   : > { %767 = vrcp.f32 %v505_v59 }
  0x74   : > { %v758_v60 = vpop.eup %757 }
  0x75   : > { %v760_v61 = vpop.eup %759  ;;  %v526_v62 = vmul.f32 %v758_v60, %v1057_v35  ;;  %v286_v35 = vmul.f32 1.442695, %v1011_v1 }
  0x76   : > { %v527_v63 = vmul.f32 %v760_v61, %v1059_v38  ;;  %v288_v38 = vmul.f32 1.442695, %v1014_v2 }
  0x77   : > { %532 = vst [vmem:[%s1070_s19] sm:$0xe0] %v526_v62  ;;  %769 = vpow2.f32 %v286_v35 }
  0x78   : > { %v762_v0 = vpop.eup %761  ;;  %533 = vst [vmem:[%s1070_s19 + $0x8] sm:$0xe0] %v527_v63  ;;  %771 = vpow2.f32 %v288_v38 }
  0x79   : > { %v764_v3 = vpop.eup %763  ;;  %v530_v4 = vmul.f32 %v762_v0, %v1074_v49  ;;  %v296_v49 = vmul.f32 1.442695, %v1026_v13  ;;  %773 = vpow2.f32 %v294_v14 }
  0x7a   : > { %v531_v5 = vmul.f32 %v764_v3, %v1079_v54  ;;  %v290_v54 = vmul.f32 1.442695, %v1033_v19 }
  0x7b   : > { %536 = vst [vmem:[%s1070_s19 + $0x20] sm:$0xe0] %v530_v4  ;;  %775 = vpow2.f32 %v296_v49 }
  0x7c   : > { %537 = vst [vmem:[%s1070_s19 + $0x28] sm:$0xe0] %v531_v5  ;;  %777 = vpow2.f32 %v290_v54 }
  0x7f   : > { %v766_v7 = vpop.eup %765 }
  0x80   : > { %v768_v8 = vpop.eup %767  ;;  %v528_v9 = vmul.f32 %v766_v7, %v1089_v6  ;;  %v292_v6 = vmul.f32 1.442695, %v1039_v26 }
  0x81   : > { %v529_v11 = vmul.f32 %v768_v8, %v1093_v12 }
  0x82   : > { %534 = vst [vmem:[%s1070_s19 + $0x10] sm:$0xe0] %v528_v9  ;;  %779 = vpow2.f32 %v292_v6 }
  0x83   : > { %535 = vst [vmem:[%s1070_s19 + $0x18] sm:$0xe0] %v529_v11 }
  0x84   : > { %v770_v12 = vpop.eup %769 }
  0x85   : > { %v772_v1 = vpop.eup %771 }
  0x86   : > { %v774_v2 = vpop.eup %773 }
  0x88   : > { %v776_v10 = vpop.eup %775 }
  0x89   : > { %v778_v19 = vpop.eup %777 }
  0x8f   : > { %v780_v22 = vpop.eup %779 }
  0xb8   : > { %v304_v13 = vpop.permute.xlu0 %303  ;;  %v312_v15 = vpop.permute.xlu1 %311 }
  0xb9   : > { %v313_v16 = vrot.slane %v304_v13, 6  ;;  %v315_v17 = vrot.slane %v312_v15, 6 }
  0xbb   : > { %v319_v18 = vmul.f32 %v770_v12, %v313_v16  ;;  %v320_v26 = vmul.f32 %v772_v1, %v313_v16  ;;  %v323_v20 = vmul.f32 %v774_v2, %v315_v17  ;;  %v324_v21 = vmul.f32 %v776_v10, %v315_v17 }
  0xbc   : > { %v308_v23 = vpop.permute.xlu0 %307 }
  0xbd   : > { %325 = vst [vmem:[%s1070_s19] sm:$0xc] %v319_v18  ;;  %326 = vst [vmem:[%s1070_s19 + $0x8] sm:$0xc] %v320_v26  ;;  %v314_v24 = vrot.slane %v308_v23, 6 }
  0xbe   : > { %329 = vst [vmem:[%s1070_s19 + $0x20] sm:$0xc] %v323_v20  ;;  %330 = vst [vmem:[%s1070_s19 + $0x28] sm:$0xc] %v324_v21 }
  0xbf   : > { %v321_v25 = vmul.f32 %v778_v19, %v314_v24  ;;  %v322_v27 = vmul.f32 %v780_v22, %v314_v24 }
  0xc1   : > { %327 = vst [vmem:[%s1070_s19 + $0x10] sm:$0xc] %v321_v25  ;;  %328 = vst [vmem:[%s1070_s19 + $0x18] sm:$0xc] %v322_v27 }
  0xc2   : > { %822 = shalt.err (!%p819_p0)
}
  0xc3   : > { %s823_s30 = scalar_lea.hbm %s1137_s16, 768  ;;  %s827_s7 = scalar_lea.hbm %s1187_s3, 1536 }
  0xc4   : > { %p824_p2 = scmp.ne.s32.totalorder %s1137_s16, %s823_s30  ;;  %p828_p3 = scmp.lt.s32.totalorder %s1137_s16, %s1187_s3 }
  0xc5   : > { %p829_p6 = scmp.lt.s32.totalorder %s827_s7, %s823_s30 }
  0xc6   : > { %p825_p9 = pnand %p824_p2, %p1197_p13 }
  0xc7   : > { %p830_p11 = por %p829_p6, %p828_p3 }
  0xc8   : > { %p826_p1 = pneg %p825_p9 }
  0xca   : > { %p831_p12 = pnand %p830_p11, %p826_p1 }
  0xcc   : > { %834 = shalt.err (!%p831_p12)
}
  0xcd   : > { %s881_s17 = smov 256   ;;  %s882_s19 = smov 16  }
  0xce   : > { %669 = dma.vmem_to_hbm [thread:$0]  (%p1197_p13), %s1139_s25, 768, %s1137_s16, %s539_s28, %s881_s17, %s881_s17, %s882_s19  }
  0xcf PF: > { %s568_s20 = sand.u32 1, %s861_s12   ;;  %p1198_p4 = scmp.ne.s32.totalorder %s1192_s24, 0 }
  0xd0   : > { %p1199_p5 = scmp.ge.s32.totalorder %s873_s15, 2  ;;  %s569_s26 = scalar_lea.sflag [#allocation4], %s568_s20 }
  0xd2   : > { %p676_p7 = pnand %p1199_p5, %p1198_p4 }
  0xd4   : > { %p677_p8 = pneg %p676_p7 }
  0xd6   : > { %856 = dma.done.wait (%p677_p8), %s569_s26, 768  }
  0xd7   : > { %858 = vsyncadd (%p677_p8), %s569_s26, 4294966528  ;;  %p16_p10 = scmp.ge.s32.totalorder %s928_s18, 4   ;;  %s1200_s12 = smov %s865_s13 }
  0xd8   : > { %s1201_s13 = smov %s869_s14  ;;  %s1202_s14 = smov %s940_s21 }
  0xd9   : > { %s1203_s15 = smov %s928_s18  ;;  %18 = sbr.rel (!%p16_p10) target bundleno = 5 (0x5), region = 83 }
  0xde   :  { %574 = vsyncpa [#allocation3], 1 }
  0xdf   :  { %576 = vsyncpa [#allocation3 + $0x1], 1 }
  0xe0   :  { %577 = vsyncpa [#allocation4], 1 }
  0xe1   :  { %579 = vsyncpa [#allocation4 + $0x1], 1 }

</bundles_post_ra>
